<compile_context>
chip_gen: v7x
topology: tpu7x:2x2x1
jax: 0.10.0
libtpu: 0.0.40
codegen_flags: <defaults>
</compile_context>

<pallas_src>
import functools

import jax
import jax.numpy as jnp
import numpy as np
from jax.experimental import pallas as pl
from jax.experimental.pallas import tpu as pltpu


# --------------------------------------------------------------------------- #
# Kernel
# --------------------------------------------------------------------------- #
def _mlp_kernel(x_ref, wgu_ref, wd_ref, o_ref, acc_ref, *, bn):
    # x_ref: (bm, H)   wgu_ref: (H, 2*bn)  [gate cols | up cols for this n-tile]
    # wd_ref: (bn, H)  o_ref/acc_ref: (bm, H)
    @pl.when(pl.program_id(1) == 0)
    def _init():
        acc_ref[...] = jnp.zeros_like(acc_ref)

    x = x_ref[...]
    # Single MXU pass for gate and up projections of this intermediate tile.
    gu = jnp.dot(x, wgu_ref[...], preferred_element_type=jnp.float32)  # (bm, 2*bn)
    gate = gu[:, :bn]
    up = gu[:, bn:]
    act = gate * jax.nn.sigmoid(gate) * up                             # SiLU(g)*u, f32

    # Partial down-projection accumulated in f32.
    # Note: act is downcast to w_down's dtype before the MXU (standard practice;
    # the f32 accumulator keeps the reduction itself exact).
    acc_ref[...] += jnp.dot(act.astype(wd_ref.dtype), wd_ref[...],
                            preferred_element_type=jnp.float32)

    @pl.when(pl.program_id(1) == pl.num_programs(1) - 1)
    def _finalize():
        o_ref[...] = acc_ref[...].astype(o_ref.dtype)


# --------------------------------------------------------------------------- #
# Tile-size selection helpers
# --------------------------------------------------------------------------- #
def _round_up(x, m):
    return ((x + m - 1) // m) * m


def _round_down(x, m):
    return (x // m) * m


def _choose_divisor_tile(n, target, granule):
    """Largest multiple of `granule` that divides n and is <= target, else full n."""
    if n <= target:
        return n
    t = _round_down(target, granule)
    while t >= granule:
        if n % t == 0:
            return t
        t -= granule
    return n


def _chip_defaults():
    """Per-generation roofline-driven tile targets and VMEM budget."""
    kind = ""
    try:
        kind = jax.devices()[0].device_kind.lower()
    except Exception:
        pass
    if "v7" in kind:
        # 64 MiB VMEM per TC, 2 TCs/chip; bm>=~311 is compute-bound.
        return dict(bm=512, bn=512, vmem_budget=56 << 20, two_core=True)
    if "v5" in kind:
        # v5e: 197 TF/s / 0.82 TB/s -> bm ~384-512 compute-bound; 128 MiB VMEM.
        return dict(bm=512, bn=256, vmem_budget=96 << 20, two_core=False)
    # v6e (and default): 918 TF/s / 1.36 TB/s -> need bm >~ 700; 128 MiB VMEM.
    return dict(bm=1024, bn=512, vmem_budget=100 << 20, two_core=False)


def _block_footprint_bytes(bm, bn, H, x_bytes, w_bytes, out_bytes):
    # x (double-buffered) + fused gate/up weights + down weights (double-buffered)
    # + out (double-buffered) + f32 accumulator scratch.
    return (2 * bm * H * x_bytes
            + 2 * (H * 2 * bn + bn * H) * w_bytes
            + 2 * bm * H * out_bytes
            + bm * H * 4)


# --------------------------------------------------------------------------- #
# Wrapper
# --------------------------------------------------------------------------- #
def llama_mlp(hidden_states, w_gate, w_up, w_down, *, block_m=None, block_n=None):
    """down_proj(SiLU(gate_proj(x)) * up_proj(x)) as one fused pallas_call.

    Weights are in (in, out) layout: w_gate/w_up (H, I), w_down (I, H).
    (For a PyTorch nn.Linear, pass `weight.T`.)
    """
    # TODO(synk): add bias support for config.mlp_bias=True (default is False).
    orig_shape = hidden_states.shape
    H = orig_shape[-1]
    I = w_gate.shape[1]
    assert w_gate.shape == (H, I) and w_up.shape == (H, I) and w_down.shape == (I, H)

    x2d = hidden_states.reshape(-1, H)
    M = x2d.shape[0]

    cfg = _chip_defaults()
    x_bytes = x2d.dtype.itemsize
    w_bytes = w_gate.dtype.itemsize

    # Row granule is dtype-aware (f32 -> 8, bf16 -> 16, int8/fp8 -> 32 sublane rows).
    granule = max(8, 32 // x_bytes)

    # ---- intermediate-dim tile (multiple of 128 dividing I; fallback full I) ----
    if block_n is not None:
        bn = block_n
        assert I % bn == 0, "block_n must divide the intermediate size"
    else:
        bn = _choose_divisor_tile(I, cfg["bn"], 128)

    # ---- row tile: primary perf knob (weights re-streamed M_pad/bm times) ----
    if block_m is not None:
        bm = block_m
    else:
        if M <= cfg["bm"]:
            bm = _round_up(M, granule)          # single (padded) m-tile; decode path
        else:
            bm = max(granule, _round_down(cfg["bm"], granule))
        # On v7x make sure the parallel axis has >=2 iterations so both TCs work.
        if cfg["two_core"] and M > granule and _round_up(M, bm) // bm < 2:
            bm = max(granule, _round_up((M + 1) // 2, granule))

    # ---- keep the block footprint inside the per-chip VMEM budget ----
    while (_block_footprint_bytes(bm, bn, H, x_bytes, w_bytes, x_bytes)
           > cfg["vmem_budget"]) and bm > granule:
        bm = max(granule, _round_down(bm // 2, granule))

    footprint = _block_footprint_bytes(bm, bn, H, x_bytes, w_bytes, x_bytes)
    vmem_limit = int(min(cfg["vmem_budget"],
                         max(32 << 20, _round_up(footprint, 1 << 20) + (16 << 20))))

    # ---- pad rows so bm always divides (fixes divisor-fallback concern) ----
    M_pad = _round_up(M, bm)
    if M_pad != M:
        x2d = jnp.pad(x2d, ((0, M_pad - M), (0, 0)))

    # ---- pack gate/up weights so each n-tile is one contiguous (H, 2*bn) slab ----
    n_blocks = I // bn
    w_gu = jnp.concatenate(
        [w_gate.reshape(H, n_blocks, bn), w_up.reshape(H, n_blocks, bn)],
        axis=2).reshape(H, 2 * I)

    kernel = functools.partial(_mlp_kernel, bn=bn)

    out = pl.pallas_call(
        kernel,
        out_shape=jax.ShapeDtypeStruct((M_pad, H), hidden_states.dtype),
        grid_spec=pltpu.PrefetchScalarGridSpec(
            num_scalar_prefetch=0,
            grid=(M_pad // bm, n_blocks),
            in_specs=[
                pl.BlockSpec((bm, H), lambda m, n: (m, 0)),        # x row tile
                pl.BlockSpec((H, 2 * bn), lambda m, n: (0, n)),    # fused gate|up slab
                pl.BlockSpec((bn, H), lambda m, n: (n, 0)),        # down_proj slice
            ],
            out_specs=pl.BlockSpec((bm, H), lambda m, n: (m, 0)),
            scratch_shapes=[pltpu.VMEM((bm, H), jnp.float32)],
        ),
        compiler_params=pltpu.CompilerParams(
            dimension_semantics=("parallel", "arbitrary"),
            vmem_limit_bytes=vmem_limit),
    )(x2d, w_gu, w_down)

    if M_pad != M:
        out = out[:M]
    return out.reshape(orig_shape)


class LlamaMLPPallas:
    """Pallas analogue of LlamaMLP (config.mlp_bias=False path).

    Weights stored in (in, out) layout: w_gate/w_up (H, I), w_down (I, H).
    """

    def __init__(self, w_gate, w_up, w_down):
        self.w_gate = w_gate
        self.w_up = w_up
        self.w_down = w_down

    def __call__(self, hidden_states, *, block_m=None, block_n=None):
        return llama_mlp(hidden_states, self.w_gate, self.w_up, self.w_down,
                         block_m=block_m, block_n=block_n)


# --------------------------------------------------------------------------- #
# Reference + tests
# --------------------------------------------------------------------------- #
def _numpy_ref(x, wg, wu, wd):
    x = np.asarray(x, np.float32)
    g = x @ np.asarray(wg, np.float32)
    u = x @ np.asarray(wu, np.float32)
    act = (g / (1.0 + np.exp(-g))) * u        # SiLU(g) * u
    return act @ np.asarray(wd, np.float32)


if __name__ == "__main__":
    key = jax.random.PRNGKey(0)

    # --- Test 1: small shapes, single grid step (full-dim blocks) -----------
    B, S, H, I = 2, 8, 32, 64
    k1, k2, k3, k4, key = jax.random.split(key, 5)
    x = jax.random.normal(k1, (B, S, H), dtype=jnp.float32)
    wg = jax.random.normal(k2, (H, I), dtype=jnp.float32) / np.sqrt(H)
    wu = jax.random.normal(k3, (H, I), dtype=jnp.float32) / np.sqrt(H)
    wd = jax.random.normal(k4, (I, H), dtype=jnp.float32) / np.sqrt(I)

    mlp = LlamaMLPPallas(wg, wu, wd)
    out = mlp(x)
    jax.block_until_ready(out)

    ref = _numpy_ref(x.reshape(-1, H), wg, wu, wd).reshape(B, S, H)
    np.testing.assert_allclose(np.asarray(out), ref, rtol=2e-2, atol=2e-2)
    assert out.shape == (B, S, H) and out.dtype == x.dtype

    # --- Test 2: tiled grid + intermediate-dim accumulation + row padding ---
    # M = 2*12 = 24 rows with block_m=16 exercises the zero-pad path (M_pad=32),
    # and block_n=128 with I=256 exercises the 2-step accumulation.
    B2, S2, H2, I2 = 2, 12, 128, 256
    k1, k2, k3, k4, key = jax.random.split(key, 5)
    x2 = jax.random.normal(k1, (B2, S2, H2), dtype=jnp.float32)
    wg2 = jax.random.normal(k2, (H2, I2), dtype=jnp.float32) / np.sqrt(H2)
    wu2 = jax.random.normal(k3, (H2, I2), dtype=jnp.float32) / np.sqrt(H2)
    wd2 = jax.random.normal(k4, (I2, H2), dtype=jnp.float32) / np.sqrt(I2)

    out2 = llama_mlp(x2, wg2, wu2, wd2, block_m=16, block_n=128)
    jax.block_until_ready(out2)

    ref2 = _numpy_ref(x2.reshape(-1, H2), wg2, wu2, wd2).reshape(B2, S2, H2)
    np.testing.assert_allclose(np.asarray(out2), ref2, rtol=2e-2, atol=2e-2)
    assert out2.shape == (B2, S2, H2) and out2.dtype == x2.dtype

    # --- Test 3: auto tile selection path (no explicit blocks) --------------
    out3 = llama_mlp(x2, wg2, wu2, wd2)
    jax.block_until_ready(out3)
    np.testing.assert_allclose(np.asarray(out3), ref2, rtol=2e-2, atol=2e-2)

    print("KERNEL_OK")
</pallas_src>

<mosaic_0001>
module attributes {stable_mosaic.version = 11 : i64} {
  func.func @_mlp_kernel(%arg0: i32, %arg1: i32, %arg2: memref<16x32xf32, #tpu.memory_space<vmem>>, %arg3: memref<32x128xf32, #tpu.memory_space<vmem>>, %arg4: memref<64x32xf32, #tpu.memory_space<vmem>>, %arg5: memref<16x32xf32, #tpu.memory_space<vmem>>, %arg6: memref<16x32xf32, #tpu.memory_space<vmem>>) attributes {dimension_semantics = [#tpu.dimension_semantics<parallel>, #tpu.dimension_semantics<arbitrary>], iteration_bounds = array<i64: 1, 1>, scalar_prefetch = 0 : i64, scratch_operands = 1 : i64, tpu.core_type = #tpu.core_type<tc>, window_params = [{transform_indices = @transform_0, window_bounds = array<i64: 16, 32>}, {transform_indices = @transform_1, window_bounds = array<i64: 32, 128>}, {transform_indices = @transform_2, window_bounds = array<i64: 64, 32>}, {transform_indices = @transform_3, window_bounds = array<i64: 16, 32>}]} {
    %c0_i32 = arith.constant 0 : i32
    %0 = arith.cmpi eq, %arg1, %c0_i32 : i32
    %1 = arith.extui %0 : i1 to i32
    %c0_i32_0 = arith.constant 0 : i32
    %2 = arith.cmpi ne, %1, %c0_i32_0 : i32
    scf.if %2 {
      %cst_14 = arith.constant 0.000000e+00 : f32
      %23 = vector.broadcast %cst_14 : f32 to vector<16x32xf32>
      %c0_15 = arith.constant 0 : index
      %c0_16 = arith.constant 0 : index
      %24 = vector.load %arg6[%c0_15, %c0_16] : memref<16x32xf32, #tpu.memory_space<vmem>>, vector<16x32xf32>
      tpu.vector_store %arg6[%c0_15, %c0_16], %23 {strides = array<i32>} : memref<16x32xf32, #tpu.memory_space<vmem>>, vector<16x32xf32>,
    } else {
    }
    %c0 = arith.constant 0 : index
    %c0_1 = arith.constant 0 : index
    %3 = vector.load %arg2[%c0, %c0_1] : memref<16x32xf32, #tpu.memory_space<vmem>>, vector<16x32xf32>
    %c0_2 = arith.constant 0 : index
    %c0_3 = arith.constant 0 : index
    %4 = vector.load %arg3[%c0_2, %c0_3] : memref<32x128xf32, #tpu.memory_space<vmem>>, vector<32x128xf32>
    %cst = arith.constant dense<0.000000e+00> : vector<16x128xf32>
    %5 = tpu.matmul %3, %4, %cst {dimension_numbers = #tpu.dot_dimension_numbers<[1], [0], [0], [1], [0, 0, 1, 1], [], []>} : vector<16x32xf32>, vector<32x128xf32>, vector<16x128xf32> -> vector<16x128xf32>
    %6 = vector.extract_strided_slice %5 {offsets = [0, 0], sizes = [16, 64], strides = [1, 1]} : vector<16x128xf32> to vector<16x64xf32>
    %7 = vector.extract_strided_slice %5 {offsets = [0, 64], sizes = [16, 64], strides = [1, 1]} : vector<16x128xf32> to vector<16x64xf32>
    %8 = arith.negf %6 : vector<16x64xf32>
    %9 = math.exp %8 : vector<16x64xf32>
    %cst_4 = arith.constant 1.000000e+00 : f32
    %10 = vector.broadcast %cst_4 : f32 to vector<16x64xf32>
    %11 = arith.addf %10, %9 : vector<16x64xf32>
    %12 = arith.divf %10, %11 : vector<16x64xf32>
    %13 = arith.mulf %6, %12 : vector<16x64xf32>
    %14 = arith.mulf %13, %7 : vector<16x64xf32>
    %c0_5 = arith.constant 0 : index
    %c0_6 = arith.constant 0 : index
    %15 = vector.load %arg6[%c0_5, %c0_6] : memref<16x32xf32, #tpu.memory_space<vmem>>, vector<16x32xf32>
    %c0_7 = arith.constant 0 : index
    %c0_8 = arith.constant 0 : index
    %16 = vector.load %arg4[%c0_7, %c0_8] : memref<64x32xf32, #tpu.memory_space<vmem>>, vector<64x32xf32>
    %cst_9 = arith.constant dense<0.000000e+00> : vector<16x32xf32>
    %17 = tpu.matmul %14, %16, %cst_9 {dimension_numbers = #tpu.dot_dimension_numbers<[1], [0], [0], [1], [0, 0, 1, 1], [], []>} : vector<16x64xf32>, vector<64x32xf32>, vector<16x32xf32> -> vector<16x32xf32>
    %18 = arith.addf %15, %17 : vector<16x32xf32>
    %c0_10 = arith.constant 0 : index
    %c0_11 = arith.constant 0 : index
    %19 = vector.load %arg6[%c0_10, %c0_11] : memref<16x32xf32, #tpu.memory_space<vmem>>, vector<16x32xf32>
    tpu.vector_store %arg6[%c0_10, %c0_11], %18 {strides = array<i32>} : memref<16x32xf32, #tpu.memory_space<vmem>>, vector<16x32xf32>,
    %c0_i32_12 = arith.constant 0 : i32
    %20 = arith.cmpi eq, %arg1, %c0_i32_12 : i32
    %21 = arith.extui %20 : i1 to i32
    %c0_i32_13 = arith.constant 0 : i32
    %22 = arith.cmpi ne, %21, %c0_i32_13 : i32
    scf.if %22 {
      %c0_14 = arith.constant 0 : index
      %c0_15 = arith.constant 0 : index
      %23 = vector.load %arg6[%c0_14, %c0_15] : memref<16x32xf32, #tpu.memory_space<vmem>>, vector<16x32xf32>
      %c0_16 = arith.constant 0 : index
      %c0_17 = arith.constant 0 : index
      %24 = vector.load %arg5[%c0_16, %c0_17] : memref<16x32xf32, #tpu.memory_space<vmem>>, vector<16x32xf32>
      tpu.vector_store %arg5[%c0_16, %c0_17], %23 {strides = array<i32>} : memref<16x32xf32, #tpu.memory_space<vmem>>, vector<16x32xf32>,
    } else {
    }
    return
  }
  func.func @transform_0(%arg0: i32, %arg1: i32) -> (i32, i32) {
    %c0_i32 = arith.constant 0 : i32
    %c0_i32_0 = arith.constant 0 : i32
    return %arg0, %c0_i32 : i32, i32
  }
  func.func @transform_1(%arg0: i32, %arg1: i32) -> (i32, i32) {
    %c0_i32 = arith.constant 0 : i32
    %c0_i32_0 = arith.constant 0 : i32
    return %c0_i32, %arg1 : i32, i32
  }
  func.func @transform_2(%arg0: i32, %arg1: i32) -> (i32, i32) {
    %c0_i32 = arith.constant 0 : i32
    %c0_i32_0 = arith.constant 0 : i32
    return %arg1, %c0_i32 : i32, i32
  }
  func.func @transform_3(%arg0: i32, %arg1: i32) -> (i32, i32) {
    %c0_i32 = arith.constant 0 : i32
    %c0_i32_0 = arith.constant 0 : i32
    return %arg0, %c0_i32 : i32, i32
  }
}

</mosaic_0001>

<bundles_post_ra>
// kernel: tpu_custom_call.1
= control target key start
LH: loop header
LB: loop body
LE: loop exit
PB: predicated region body
PF: predicated region fallthrough
CT: control target
= control target key end

     0   :  { %vm19_vm0 = vcmask 261120   ;;  %s453_s0 = inlined_call_operand.vmem [shape: f32[16,32], index: 0, kind: input, shape index: {}]   ;;  %s454_s1 = inlined_call_operand.vmem [shape: f32[32,128], index: 1, kind: input, shape index: {}]   ;;  %s455_s2 = inlined_call_operand.vmem [shape: f32[64,32], index: 2, kind: input, shape index: {}]   ;;  %s456_s3 = inlined_call_operand.hbm [shape: f32[16,32], index: 3, kind: output, shape index: {}]  }
   0x1   :  { %v24_v0 = vld [vmem:[%s454_s1] sm:$0xff]  ;;  %v25_v1 = vld [vmem:[%s454_s1 + $0x8] sm:$0xff]  ;;  %v26_v2 = vld [vmem:[%s454_s1 + $0x10] sm:$0xff] }
   0x2   :  { %v305_v3 = vpack.c.bf16 %v25_v1, %v24_v0  ;;  %v27_v4 = vld [vmem:[%s454_s1 + $0x18] sm:$0xff]  ;;  %v22_v5 = vld [vmem:[%s453_s0] sm:$0xff] }
   0x3   :  { %v309_v6 = vpack.c.bf16 %v27_v4, %v26_v2  ;;  %283 = vmatprep.mubr.msk.f32.mxu0 %vm19_vm0, %v22_v5 }
   0x4   :  { %8 = vsyncpa [#allocation4], 0  ;;  %306 = vmatprep.subr.bf16.mxu0 %v305_v3  ;;  %v23_v7 = vld [vmem:[%s453_s0 + $0x8] sm:$0xff]  ;;  %v136_v8 = vld [vmem:[%s455_s2] sm:$0xff]  ;;  %v366_v20 = vmov 0.0   ;;  %s367_s11 = smov 64  }
   0x5   :  { %308 = vmatpush3.bf16.msra.mxu0 %v305_v3  ;;  %v137_v9 = vld [vmem:[%s455_s2 + $0x8] sm:$0xff]  ;;  %v138_v10 = vld [vmem:[%s455_s2 + $0x10] sm:$0xff]  ;;  %v139_v12 = vld [vmem:[%s455_s2 + $0x18] sm:$0xff]  ;;  %21 = vst.msk [vmem:[#allocation2 + $0x8] sm:$0xff] %vm19_vm0, %v366_v20  ;;  %vm144_vm1 = vcmask 523264  }
   0x6   :  { %310 = vmatprep.subr.bf16.mxu0 %v309_v6  ;;  %v313_v11 = vpack.c.bf16 %v137_v9, %v136_v8  ;;  %v317_v13 = vpack.c.bf16 %v139_v12, %v138_v10  ;;  %v140_v14 = vld [vmem:[%s455_s2 + $0x20] sm:$0xff]  ;;  %v141_v15 = vld [vmem:[%s455_s2 + $0x28] sm:$0xff]  ;;  %v142_v17 = vld [vmem:[%s455_s2 + $0x30] sm:$0xff]  ;;  %20 = vst.msk [vmem:[#allocation2] sm:$0xff] %vm19_vm0, %v366_v20 }
   0x7   :  { %v321_v16 = vpack.c.bf16 %v141_v15, %v140_v14  ;;  %v143_v18 = vld [vmem:[%s455_s2 + $0x38] sm:$0xff]  ;;  %s368_s2 = smov [#allocation3]  }
   0x8   :  { %314 = vmatprep.subr.bf16.mxu1 %v313_v11  ;;  %v325_v19 = vpack.c.bf16 %v143_v18, %v142_v17  ;;  %s242_s12 = sshll.u32 %s368_s2, 4  ;;  %s243_s12 = int_to_ptr.vmem [resolvable:$true] %s242_s12 }
   0x9   :  { %312 = vmatpush3.bf16.msra.mxu0 %v309_v6  ;;  %316 = vmatpush3.bf16.msra.mxu1 %v313_v11  ;;  %s342_s13 = scalar_lea.vmem %s243_s12, 256  ;;  %p347_p1 = scmp.lt.s32.totalorder %s243_s12, %s243_s12 }
   0xa   :  { %318 = vmatprep.subr.bf16.mxu1 %v317_v13  ;;  %p343_p0 = scmp.ne.s32.totalorder %s243_s12, %s342_s13  ;;  %p348_p2 = scmp.lt.s32.totalorder %s342_s13, %s342_s13 }
   0xc   :  { %284 = vmatmul.mubr.msk.f32.vlgmr.msra.gmra.mrb[0].mxu0 %vm19_vm0, %v23_v7  ;;  %v135_v37 = vld [vmem:[#allocation2 + $0x8] sm:$0xff]  ;;  %p349_p3 = por %p348_p2, %p347_p1 }
   0xd   :  { %320 = vmatpush3.bf16.msra.mxu1 %v317_v13  ;;  %v134_v38 = vld [vmem:[#allocation2] sm:$0xff] }
   0xe   :  { %322 = vmatprep.subr.bf16.mxu1 %v321_v16  ;;  %p350_p4 = pnand %p349_p3, %p343_p0 }
  0x11   :  { %324 = vmatpush3.bf16.msra.mxu1 %v321_v16 }
  0x12   :  { %326 = vmatprep.subr.bf16.mxu1 %v325_v19 }
  0x15   :  { %328 = vmatpush3.bf16.msra.mxu1 %v325_v19 }
  0xdf   :  { %v285_v21 = vpop.f32.mrb[0].mxu0 }
  0xe0   :  { %v101_v22 = vpop.f32.mrb[1].mxu0  ;;  %v256_v24 = vmul.f32 -1.442695, %v285_v21 }
  0xe1   :  { %126 = vrot.lane.b32.xlu0 %v101_v22, %s367_s11  ;;  %v255_v23 = vmul.f32 -1.442695, %v101_v22 }
  0xe3   :  { %334 = vpow2.f32 %v255_v23 }
  0xe4   :  { %336 = vpow2.f32 %v256_v24 }
  0xe5   :  { %128 = vrot.lane.b32.xlu0 %v285_v21, %s367_s11 }
  0xed   :  { %v335_v25 = vpop.eup %334 }
  0xee   :  { %v116_v26 = vadd.f32 1.0, %v335_v25  ;;  %v337_v27 = vpop.eup %336 }
  0xef   :  { %v117_v28 = vadd.f32 1.0, %v337_v27 }
  0xf0   :  { %338 = vrcp.f32 %v116_v26 }
  0xf1   :  { %340 = vrcp.f32 %v117_v28 }
  0xfa   :  { %v339_v29 = vpop.eup %338 }
  0xfb   :  { %v122_v30 = vmul.f32 %v339_v29, %v101_v22  ;;  %v341_v31 = vpop.eup %340 }
  0xfc   :  { %v123_v34 = vmul.f32 %v341_v31, %v285_v21 }
 0x153   :  { %v127_v32 = vpop.permute.xlu0 %126 }
 0x154   :  { %v132_v33 = vmul.f32 %v127_v32, %v122_v30 }
 0x156   :  { %302 = vmatprep.mubr.msk.f32.mxu1 %vm144_vm1, %v132_v33 }
 0x157   :  { %v129_v35 = vpop.permute.xlu0 %128 }
 0x158   :  { %v133_v36 = vmul.f32 %v129_v35, %v123_v34 }
 0x15a   :  { %303 = vmatmul.mubr.msk.f32.vlgmr.msra.gmra.mrb[0].mxu1 %vm144_vm1, %v133_v36 }
 0x22d   :  { %v304_v39 = vpop.f32.mrb[0].mxu1 }
 0x22e   :  { %v227_v40 = vadd.f32 %v304_v39, %v135_v37  ;;  %v217_v41 = vpop.f32.mrb[1].mxu1 }
 0x22f   :  { %v226_v42 = vadd.f32 %v217_v41, %v134_v38 }
 0x230   :  { %229 = vst.msk [vmem:[#allocation2 + $0x8] sm:$0xff] %vm19_vm0, %v227_v40 }
 0x231   :  { %228 = vst.msk [vmem:[#allocation2] sm:$0xff] %vm19_vm0, %v226_v42 }
 0x237   :  { %v234_v43 = vld [vmem:[#allocation2 + $0x8] sm:$0xff] }
 0x238   :  { %v233_v44 = vld [vmem:[#allocation2] sm:$0xff]  ;;  %236 = vst.msk [vmem:[#allocation3 + $0x8] sm:$0xff] %vm19_vm0, %v234_v43 }
 0x239   :  { %235 = vst.msk [vmem:[#allocation3] sm:$0xff] %vm19_vm0, %v233_v44 }
 0x23a   :  { %353 = shalt.err (!%p350_p4)
}
 0x23b   :  { %s354_s16 = scalar_lea.hbm %s456_s3, 256 }
 0x23c   :  { %p355_p5 = scmp.ne.s32.totalorder %s456_s3, %s354_s16  ;;  %p358_p6 = scmp.lt.u32.totalorder %s354_s16, %s456_s3 }
 0x23e   :  { %p360_p7 = pnand %p358_p6, %p355_p5 }
 0x240   :  { %363 = shalt.err (!%p360_p7)
}
 0x241   :  { %s369_s21 = smov 128   ;;  %s370_s22 = smov 8  }
 0x242   :  { %248 = dma.vmem_to_hbm [thread:$0]  %s243_s12, 256, %s456_s3, [#allocation4], %s369_s21, %s369_s21, %s370_s22  }
 0x243   :  { %364 = dma.done.wait [#allocation4], 256  }
 0x244   :  { %365 = vsyncadd [#allocation4], 4294967040 }
 0x245   :  { %252 = vsyncpa [#allocation4], 1 }

</bundles_post_ra>
